<compile_context>
chip_gen: v7x
topology: tpu7x:2x2x1
jax: 0.10.0
libtpu: 0.0.40
codegen_flags: <defaults>
</compile_context>

<pallas_src>
import math

import jax
import jax.numpy as jnp
from jax import lax
from jax.experimental import pallas as pl
from jax.experimental.pallas import tpu as pltpu


def _gelu_exact(x):
    # Matches torch.nn.functional.gelu default (erf-based, exact).
    return 0.5 * x * (1.0 + lax.erf(x / jnp.sqrt(jnp.float32(2.0))))


def estate_head_kernel(
    ha_ref,        # (1, S, H)  hidden state A block for this batch row
    hb_ref,        # (1, S, H)  hidden state B block for this batch row
    mask_ref,      # (1, 1, S)  additive attention mask (lane-dense)
    time_emb_ref,  # (B, H)     month embedding (VMEM-resident)
    wpa_ref, wpb_ref, bp_ref,   # AttentionPooling.proj split: (H,H),(H,H),(1,H)
    wa_ref, ba_ref,             # attention weight row (1,H) & bias (1,1), pre-scaled by 1/sqrt(H)
    wo_ref, bo_ref,             # AttentionPooling.out_proj : (H,H),(1,H)
    wh_ref, bh_ref,             # RegressionLayer.hidden_proj: (H,2H),(1,2H)
    wr_ref, br_ref,             # RegressionLayer.output_proj: (2H,1),(1,1)
    out_ref,                    # (B, 1)  written once, on the last grid step
    pooled_ref,                 # VMEM scratch (B, H): one pooled row per batch element
):
    b = pl.program_id(0)

    a = ha_ref[0]                                                   # (S, H)
    c = hb_ref[0]                                                   # (S, H)

    # AttentionPooling.proj without concatenating [a, c]:
    #   x = [a, c] @ wp + bp = a @ wp_a + c @ wp_b + bp
    x = (jnp.dot(a, wpa_ref[...], preferred_element_type=jnp.float32)
         + jnp.dot(c, wpb_ref[...], preferred_element_type=jnp.float32)
         + bp_ref[...])                                             # (S, H)

    # Lane-dense attention scores: (1, S), contracting over H (MXU).
    # wa/ba are pre-scaled by 1/sqrt(H) in the wrapper (no in-kernel divide).
    s_row = jnp.einsum("od,sd->os", wa_ref[...], x,
                       preferred_element_type=jnp.float32)          # (1, S)
    s_row = s_row + ba_ref[...] + mask_ref[0]                       # (1, S)

    # Softmax over the lane (sequence) axis.
    m = jnp.max(s_row, axis=-1, keepdims=True)
    e = jnp.exp(s_row - m)
    w = e / jnp.sum(e, axis=-1, keepdims=True)                      # (1, S)

    # Weighted pooling on the MXU: (1, S) @ (S, H).
    pooled_row = jnp.dot(w, x, preferred_element_type=jnp.float32)  # (1, H)
    pooled_ref[pl.ds(b, 1), :] = pooled_row

    # Tiny latency-bound tail: run once over the accumulated (B, H) rows and
    # write the (B, 1) output exactly once.
    @pl.when(b == pl.num_programs(0) - 1)
    def _tail():
        pooled = (jnp.dot(pooled_ref[...], wo_ref[...],
                          preferred_element_type=jnp.float32)
                  + bo_ref[...])                                    # (B, H)
        added = _gelu_exact(pooled + time_emb_ref[...])             # (B, H)
        h = _gelu_exact(jnp.dot(added, wh_ref[...],
                                preferred_element_type=jnp.float32)
                        + bh_ref[...])                              # (B, 2H)
        out_ref[...] = (jnp.dot(h, wr_ref[...],
                                preferred_element_type=jnp.float32)
                        + br_ref[...])                              # (B, 1)


def estate_forward(hidden_a, hidden_b, attention_mask, time_input, params):
    """JAX glue (mask/embedding/weight prep) + one fused, gridded Pallas call."""
    B, S, H = hidden_a.shape

    # Additive mask, lane-dense: (B, 1, S) with S on the lane axis.
    mask_add = ((1.0 - attention_mask.astype(jnp.float32))
                * jnp.finfo(jnp.float32).min).reshape(B, 1, S)

    # Month embedding lookup (TimeEmbedding); gather stays in plain JAX glue.
    month = time_input[:, 0]                       # split(time_input, 1, dim=1)[0]
    time_emb = params["month_embedding"][month]    # (B, H)

    # Split proj weight so the kernel never needs the concatenated input.
    wp_a = params["wp"][:H, :]                     # (H, H)
    wp_b = params["wp"][H:, :]                     # (H, H)

    # Fold 1/sqrt(H) into the attention weight/bias; store the weight as a
    # (1, H) row for the lane-dense score contraction.
    inv_scale = jnp.float32(1.0 / math.sqrt(H))
    wa_row = (params["wa"] * inv_scale).reshape(1, H)   # (1, H)
    ba_s = params["ba"] * inv_scale                     # (1, 1)

    def res(shape):
        # VMEM-resident array: constant block index across the whole grid.
        return pl.BlockSpec(shape, lambda b, _n=len(shape): (0,) * _n)

    grid_spec = pltpu.PrefetchScalarGridSpec(
        num_scalar_prefetch=0,
        grid=(B,),
        in_specs=[
            pl.BlockSpec((1, S, H), lambda b: (b, 0, 0)),   # hidden_a
            pl.BlockSpec((1, S, H), lambda b: (b, 0, 0)),   # hidden_b
            pl.BlockSpec((1, 1, S), lambda b: (b, 0, 0)),   # additive mask
            res((B, H)),                                    # time_emb
            res((H, H)), res((H, H)), res((1, H)),          # wp_a, wp_b, bp
            res((1, H)), res((1, 1)),                       # wa_row, ba (pre-scaled)
            res((H, H)), res((1, H)),                       # wo, bo
            res((H, 2 * H)), res((1, 2 * H)),               # wh, bh
            res((2 * H, 1)), res((1, 1)),                   # wr, br
        ],
        out_specs=pl.BlockSpec((B, 1), lambda b: (0, 0)),
        scratch_shapes=[pltpu.VMEM((B, H), jnp.float32)],
    )

    return pl.pallas_call(
        estate_head_kernel,
        out_shape=jax.ShapeDtypeStruct((B, 1), jnp.float32),
        grid_spec=grid_spec,
        compiler_params=pltpu.CompilerParams(
            # The batch axis carries the pooled-row accumulation (scratch read
            # at the last step), so it must be "arbitrary". A v7x 2-TC variant
            # would run the tail per step and mark this axis "parallel".
            dimension_semantics=("arbitrary",),
            vmem_limit_bytes=48 * 1024 * 1024,
        ),
    )(
        hidden_a, hidden_b, mask_add, time_emb,
        wp_a, wp_b, params["bp"],
        wa_row, ba_s,
        params["wo"], params["bo"],
        params["wh"], params["bh"],
        params["wr"], params["br"],
    )


def reference_forward(hidden_a, hidden_b, attention_mask, time_input, p):
    """Pure-JAX reference mirroring the PyTorch forward semantics."""
    B, S, H = hidden_a.shape
    x = jnp.concatenate([hidden_a, hidden_b], axis=-1)                   # (B, S, 2H)
    x = x @ p["wp"] + p["bp"]                                            # (B, S, H)
    scores = (x @ p["wa"] + p["ba"]) / math.sqrt(H)                      # (B, S, 1)
    mask_add = (1.0 - attention_mask[:, :, None].astype(jnp.float32)) * jnp.finfo(jnp.float32).min
    scores = scores + mask_add
    w = jax.nn.softmax(scores, axis=1)
    pooled = jnp.sum(w * x, axis=1)                                      # (B, H)
    pooled = pooled @ p["wo"] + p["bo"]
    te = p["month_embedding"][time_input[:, 0]]
    added = jax.nn.gelu(pooled + te, approximate=False)
    h = jax.nn.gelu(added @ p["wh"] + p["bh"], approximate=False)
    return h @ p["wr"] + p["br"]


def make_params(key, H):
    """Deterministic synthetic parameters (PyTorch Linear weights stored transposed)."""
    ks = jax.random.split(key, 12)
    s = 0.02
    return {
        "month_embedding": jax.random.normal(ks[0], (12, H), jnp.float32) * s,
        # AttentionPooling.proj: Linear(2H -> H)
        "wp": jax.random.normal(ks[1], (2 * H, H), jnp.float32) * s,
        "bp": jax.random.normal(ks[2], (1, H), jnp.float32) * s,
        # AttentionPooling.attention: Linear(H -> 1)
        "wa": jax.random.normal(ks[3], (H, 1), jnp.float32) * s,
        "ba": jax.random.normal(ks[4], (1, 1), jnp.float32) * s,
        # AttentionPooling.out_proj: Linear(H -> H)
        "wo": jax.random.normal(ks[5], (H, H), jnp.float32) * s,
        "bo": jax.random.normal(ks[6], (1, H), jnp.float32) * s,
        # RegressionLayer.hidden_proj: Linear(H -> 2H)
        "wh": jax.random.normal(ks[7], (H, 2 * H), jnp.float32) * s,
        "bh": jax.random.normal(ks[8], (1, 2 * H), jnp.float32) * s,
        # RegressionLayer.output_proj: Linear(2H -> 1)
        "wr": jax.random.normal(ks[9], (2 * H, 1), jnp.float32) * s,
        "br": jax.random.normal(ks[10], (1, 1), jnp.float32) * s,
    }


if __name__ == "__main__":
    # Small shapes consistent with the module (original uses H=768, here H=128).
    B, S, H = 2, 8, 128

    key = jax.random.PRNGKey(0)
    k_p, k_a, k_b = jax.random.split(key, 3)

    params = make_params(k_p, H)

    # Synthetic "last two hidden states" of the (unimplemented) T5 encoder.
    hidden_a = jax.random.normal(k_a, (B, S, H), jnp.float32)
    hidden_b = jax.random.normal(k_b, (B, S, H), jnp.float32)

    # attention_mask: first row has 2 padded positions, second row fully valid.
    attention_mask = jnp.array(
        [[1] * (S - 2) + [0] * 2, [1] * S], dtype=jnp.int32
    )
    # time_input: (B, 2) = [month, year]
    time_input = jnp.array([[3, 21], [11, 47]], dtype=jnp.int32)

    out = estate_forward(hidden_a, hidden_b, attention_mask, time_input, params)
    out = jax.block_until_ready(out)

    ref = reference_forward(hidden_a, hidden_b, attention_mask, time_input, params)
    assert out.shape == (B, 1)
    assert jnp.allclose(out, ref, atol=2e-3, rtol=2e-3), (out, ref)

    print("KERNEL_OK")
</pallas_src>

<mosaic_0001>
module attributes {stable_mosaic.version = 11 : i64} {
  func.func @estate_head_kernel(%arg0: i32, %arg1: memref<1x8x128xf32, #tpu.memory_space<vmem>>, %arg2: memref<1x8x128xf32, #tpu.memory_space<vmem>>, %arg3: memref<1x1x8xf32, #tpu.memory_space<vmem>>, %arg4: memref<2x128xf32, #tpu.memory_space<vmem>>, %arg5: memref<128x128xf32, #tpu.memory_space<vmem>>, %arg6: memref<128x128xf32, #tpu.memory_space<vmem>>, %arg7: memref<1x128xf32, #tpu.memory_space<vmem>>, %arg8: memref<1x128xf32, #tpu.memory_space<vmem>>, %arg9: memref<1x1xf32, #tpu.memory_space<vmem>>, %arg10: memref<128x128xf32, #tpu.memory_space<vmem>>, %arg11: memref<1x128xf32, #tpu.memory_space<vmem>>, %arg12: memref<128x256xf32, #tpu.memory_space<vmem>>, %arg13: memref<1x256xf32, #tpu.memory_space<vmem>>, %arg14: memref<256x1xf32, #tpu.memory_space<vmem>>, %arg15: memref<1x1xf32, #tpu.memory_space<vmem>>, %arg16: memref<2x1xf32, #tpu.memory_space<vmem>>, %arg17: memref<2x128xf32, #tpu.memory_space<vmem>>) attributes {dimension_semantics = [#tpu.dimension_semantics<arbitrary>], iteration_bounds = array<i64: 2>, scalar_prefetch = 0 : i64, scratch_operands = 1 : i64, tpu.core_type = #tpu.core_type<tc>, window_params = [{transform_indices = @transform_0, window_bounds = array<i64: 1, 8, 128>}, {transform_indices = @transform_1, window_bounds = array<i64: 1, 8, 128>}, {transform_indices = @transform_2, window_bounds = array<i64: 1, 1, 8>}, {pipeline_mode = #tpu.pipeline_mode<synchronous>, transform_indices = @transform_3, window_bounds = array<i64: 2, 128>}, {pipeline_mode = #tpu.pipeline_mode<synchronous>, transform_indices = @transform_4, window_bounds = array<i64: 128, 128>}, {pipeline_mode = #tpu.pipeline_mode<synchronous>, transform_indices = @transform_5, window_bounds = array<i64: 128, 128>}, {pipeline_mode = #tpu.pipeline_mode<synchronous>, transform_indices = @transform_6, window_bounds = array<i64: 1, 128>}, {pipeline_mode = #tpu.pipeline_mode<synchronous>, transform_indices = @transform_7, window_bounds = array<i64: 1, 128>}, {pipeline_mode = #tpu.pipeline_mode<synchronous>, transform_indices = @transform_8, window_bounds = array<i64: 1, 1>}, {pipeline_mode = #tpu.pipeline_mode<synchronous>, transform_indices = @transform_9, window_bounds = array<i64: 128, 128>}, {pipeline_mode = #tpu.pipeline_mode<synchronous>, transform_indices = @transform_10, window_bounds = array<i64: 1, 128>}, {pipeline_mode = #tpu.pipeline_mode<synchronous>, transform_indices = @transform_11, window_bounds = array<i64: 128, 256>}, {pipeline_mode = #tpu.pipeline_mode<synchronous>, transform_indices = @transform_12, window_bounds = array<i64: 1, 256>}, {pipeline_mode = #tpu.pipeline_mode<synchronous>, transform_indices = @transform_13, window_bounds = array<i64: 256, 1>}, {pipeline_mode = #tpu.pipeline_mode<synchronous>, transform_indices = @transform_14, window_bounds = array<i64: 1, 1>}, {pipeline_mode = #tpu.pipeline_mode<synchronous>, transform_indices = @transform_15, window_bounds = array<i64: 2, 1>}]} {
    %c0 = arith.constant 0 : index
    %c0_0 = arith.constant 0 : index
    %c0_1 = arith.constant 0 : index
    %0 = vector.load %arg1[%c0, %c0_0, %c0_1] : memref<1x8x128xf32, #tpu.memory_space<vmem>>, vector<1x8x128xf32>
    %1 = vector.shape_cast %0 : vector<1x8x128xf32> to vector<8x128xf32>
    %c0_2 = arith.constant 0 : index
    %c0_3 = arith.constant 0 : index
    %c0_4 = arith.constant 0 : index
    %2 = vector.load %arg2[%c0_2, %c0_3, %c0_4] : memref<1x8x128xf32, #tpu.memory_space<vmem>>, vector<1x8x128xf32>
    %3 = vector.shape_cast %2 : vector<1x8x128xf32> to vector<8x128xf32>
    %c0_5 = arith.constant 0 : index
    %c0_6 = arith.constant 0 : index
    %4 = vector.load %arg5[%c0_5, %c0_6] : memref<128x128xf32, #tpu.memory_space<vmem>>, vector<128x128xf32>
    %cst = arith.constant dense<0.000000e+00> : vector<8x128xf32>
    %5 = tpu.matmul %1, %4, %cst {dimension_numbers = #tpu.dot_dimension_numbers<[1], [0], [0], [1], [0, 0, 1, 1], [], []>} : vector<8x128xf32>, vector<128x128xf32>, vector<8x128xf32> -> vector<8x128xf32>
    %c0_7 = arith.constant 0 : index
    %c0_8 = arith.constant 0 : index
    %6 = vector.load %arg6[%c0_7, %c0_8] : memref<128x128xf32, #tpu.memory_space<vmem>>, vector<128x128xf32>
    %cst_9 = arith.constant dense<0.000000e+00> : vector<8x128xf32>
    %7 = tpu.matmul %3, %6, %cst_9 {dimension_numbers = #tpu.dot_dimension_numbers<[1], [0], [0], [1], [0, 0, 1, 1], [], []>} : vector<8x128xf32>, vector<128x128xf32>, vector<8x128xf32> -> vector<8x128xf32>
    %8 = arith.addf %5, %7 : vector<8x128xf32>
    %c0_10 = arith.constant 0 : index
    %c0_11 = arith.constant 0 : index
    %9 = vector.load %arg7[%c0_10, %c0_11] : memref<1x128xf32, #tpu.memory_space<vmem>>, vector<1x128xf32>
    %10 = vector.broadcast %9 : vector<1x128xf32> to vector<8x128xf32>
    %11 = arith.addf %8, %10 : vector<8x128xf32>
    %c0_12 = arith.constant 0 : index
    %c0_13 = arith.constant 0 : index
    %12 = vector.load %arg8[%c0_12, %c0_13] : memref<1x128xf32, #tpu.memory_space<vmem>>, vector<1x128xf32>
    "tpu.trace_start"() <{level = 10 : i32, message = "od,sd->os"}> : () -> ()
    %cst_14 = arith.constant dense<0.000000e+00> : vector<1x8xf32>
    %13 = tpu.matmul %12, %11, %cst_14 {dimension_numbers = #tpu.dot_dimension_numbers<[1], [1], [0], [0], [0, 0, 1, 0], [], []>} : vector<1x128xf32>, vector<8x128xf32>, vector<1x8xf32> -> vector<1x8xf32>
    "tpu.trace_stop"() : () -> ()
    %c0_15 = arith.constant 0 : index
    %c0_16 = arith.constant 0 : index
    %14 = vector.load %arg9[%c0_15, %c0_16] : memref<1x1xf32, #tpu.memory_space<vmem>>, vector<1x1xf32>
    %15 = vector.broadcast %14 : vector<1x1xf32> to vector<1x8xf32>
    %16 = arith.addf %13, %15 : vector<1x8xf32>
    %c0_17 = arith.constant 0 : index
    %c0_18 = arith.constant 0 : index
    %c0_19 = arith.constant 0 : index
    %17 = vector.load %arg3[%c0_17, %c0_18, %c0_19] : memref<1x1x8xf32, #tpu.memory_space<vmem>>, vector<1x1x8xf32>
    %18 = vector.shape_cast %17 : vector<1x1x8xf32> to vector<1x8xf32>
    %19 = arith.addf %16, %18 : vector<1x8xf32>
    %cst_20 = arith.constant dense<0xFF800000> : vector<1xf32>
    %20 = vector.multi_reduction <maximumf>, %19, %cst_20 [1] : vector<1x8xf32> to vector<1xf32>
    %21 = vector.shape_cast %20 : vector<1xf32> to vector<1x1xf32>
    %22 = vector.broadcast %21 : vector<1x1xf32> to vector<1x8xf32>
    %23 = arith.subf %19, %22 : vector<1x8xf32>
    %24 = math.exp %23 : vector<1x8xf32>
    %cst_21 = arith.constant dense<0.000000e+00> : vector<1xf32>
    %25 = vector.multi_reduction <add>, %24, %cst_21 [1] : vector<1x8xf32> to vector<1xf32>
    %26 = vector.shape_cast %25 : vector<1xf32> to vector<1x1xf32>
    %27 = vector.broadcast %26 : vector<1x1xf32> to vector<1x8xf32>
    %28 = arith.divf %24, %27 : vector<1x8xf32>
    %cst_22 = arith.constant dense<0.000000e+00> : vector<1x128xf32>
    %29 = tpu.matmul %28, %11, %cst_22 {dimension_numbers = #tpu.dot_dimension_numbers<[1], [0], [0], [1], [0, 0, 1, 1], [], []>} : vector<1x8xf32>, vector<8x128xf32>, vector<1x128xf32> -> vector<1x128xf32>
    %30 = arith.index_cast %arg0 : i32 to index
    %c0_23 = arith.constant 0 : index
    %31 = vector.load %arg17[%30, %c0_23] : memref<2x128xf32, #tpu.memory_space<vmem>>, vector<1x128xf32>
    tpu.vector_store %arg17[%30, %c0_23], %29 {strides = array<i32>} : memref<2x128xf32, #tpu.memory_space<vmem>>, vector<1x128xf32>,
    %c1_i32 = arith.constant 1 : i32
    %32 = arith.cmpi eq, %arg0, %c1_i32 : i32
    %33 = arith.extui %32 : i1 to i32
    %c0_i32 = arith.constant 0 : i32
    %34 = arith.cmpi ne, %33, %c0_i32 : i32
    scf.if %34 {
      %c0_24 = arith.constant 0 : index
      %c0_25 = arith.constant 0 : index
      %35 = vector.load %arg17[%c0_24, %c0_25] : memref<2x128xf32, #tpu.memory_space<vmem>>, vector<2x128xf32>
      %c0_26 = arith.constant 0 : index
      %c0_27 = arith.constant 0 : index
      %36 = vector.load %arg10[%c0_26, %c0_27] : memref<128x128xf32, #tpu.memory_space<vmem>>, vector<128x128xf32>
      %cst_28 = arith.constant dense<0.000000e+00> : vector<2x128xf32>
      %37 = tpu.matmul %35, %36, %cst_28 {dimension_numbers = #tpu.dot_dimension_numbers<[1], [0], [0], [1], [0, 0, 1, 1], [], []>} : vector<2x128xf32>, vector<128x128xf32>, vector<2x128xf32> -> vector<2x128xf32>
      %c0_29 = arith.constant 0 : index
      %c0_30 = arith.constant 0 : index
      %38 = vector.load %arg11[%c0_29, %c0_30] : memref<1x128xf32, #tpu.memory_space<vmem>>, vector<1x128xf32>
      %39 = vector.broadcast %38 : vector<1x128xf32> to vector<2x128xf32>
      %40 = arith.addf %37, %39 : vector<2x128xf32>
      %c0_31 = arith.constant 0 : index
      %c0_32 = arith.constant 0 : index
      %41 = vector.load %arg4[%c0_31, %c0_32] : memref<2x128xf32, #tpu.memory_space<vmem>>, vector<2x128xf32>
      %42 = arith.addf %40, %41 : vector<2x128xf32>
      %cst_33 = arith.constant 5.000000e-01 : f32
      %43 = vector.broadcast %cst_33 : f32 to vector<2x128xf32>
      %44 = arith.mulf %43, %42 : vector<2x128xf32>
      %cst_34 = arith.constant 2.000000e+00 : f32
      %45 = math.sqrt %cst_34 : f32
      %46 = vector.broadcast %45 : f32 to vector<2x128xf32>
      %47 = arith.divf %42, %46 : vector<2x128xf32>
      %48 = math.erf %47 : vector<2x128xf32>
      %cst_35 = arith.constant 1.000000e+00 : f32
      %49 = vector.broadcast %cst_35 : f32 to vector<2x128xf32>
      %50 = arith.addf %49, %48 : vector<2x128xf32>
      %51 = arith.mulf %44, %50 : vector<2x128xf32>
      %c0_36 = arith.constant 0 : index
      %c0_37 = arith.constant 0 : index
      %52 = vector.load %arg12[%c0_36, %c0_37] : memref<128x256xf32, #tpu.memory_space<vmem>>, vector<128x256xf32>
      %cst_38 = arith.constant dense<0.000000e+00> : vector<2x256xf32>
      %53 = tpu.matmul %51, %52, %cst_38 {dimension_numbers = #tpu.dot_dimension_numbers<[1], [0], [0], [1], [0, 0, 1, 1], [], []>} : vector<2x128xf32>, vector<128x256xf32>, vector<2x256xf32> -> vector<2x256xf32>
      %c0_39 = arith.constant 0 : index
      %c0_40 = arith.constant 0 : index
      %54 = vector.load %arg13[%c0_39, %c0_40] : memref<1x256xf32, #tpu.memory_space<vmem>>, vector<1x256xf32>
      %55 = vector.broadcast %54 : vector<1x256xf32> to vector<2x256xf32>
      %56 = arith.addf %53, %55 : vector<2x256xf32>
      %cst_41 = arith.constant 5.000000e-01 : f32
      %57 = vector.broadcast %cst_41 : f32 to vector<2x256xf32>
      %58 = arith.mulf %57, %56 : vector<2x256xf32>
      %cst_42 = arith.constant 2.000000e+00 : f32
      %59 = math.sqrt %cst_42 : f32
      %60 = vector.broadcast %59 : f32 to vector<2x256xf32>
      %61 = arith.divf %56, %60 : vector<2x256xf32>
      %62 = math.erf %61 : vector<2x256xf32>
      %cst_43 = arith.constant 1.000000e+00 : f32
      %63 = vector.broadcast %cst_43 : f32 to vector<2x256xf32>
      %64 = arith.addf %63, %62 : vector<2x256xf32>
      %65 = arith.mulf %58, %64 : vector<2x256xf32>
      %c0_44 = arith.constant 0 : index
      %c0_45 = arith.constant 0 : index
      %66 = vector.load %arg14[%c0_44, %c0_45] : memref<256x1xf32, #tpu.memory_space<vmem>>, vector<256x1xf32>
      %cst_46 = arith.constant dense<0.000000e+00> : vector<2x1xf32>
      %67 = tpu.matmul %65, %66, %cst_46 {dimension_numbers = #tpu.dot_dimension_numbers<[1], [0], [0], [1], [0, 0, 1, 1], [], []>} : vector<2x256xf32>, vector<256x1xf32>, vector<2x1xf32> -> vector<2x1xf32>
      %c0_47 = arith.constant 0 : index
      %c0_48 = arith.constant 0 : index
      %68 = vector.load %arg15[%c0_47, %c0_48] : memref<1x1xf32, #tpu.memory_space<vmem>>, vector<1x1xf32>
      %69 = vector.broadcast %68 : vector<1x1xf32> to vector<2x1xf32>
      %70 = arith.addf %67, %69 : vector<2x1xf32>
      %c0_49 = arith.constant 0 : index
      %c0_50 = arith.constant 0 : index
      %71 = vector.load %arg16[%c0_49, %c0_50] : memref<2x1xf32, #tpu.memory_space<vmem>>, vector<2x1xf32>
      tpu.vector_store %arg16[%c0_49, %c0_50], %70 {strides = array<i32>} : memref<2x1xf32, #tpu.memory_space<vmem>>, vector<2x1xf32>,
    } else {
    }
    return
  }
  func.func @transform_0(%arg0: i32) -> (i32, i32, i32) {
    %c0_i32 = arith.constant 0 : i32
    %c0_i32_0 = arith.constant 0 : i32
    %c0_i32_1 = arith.constant 0 : i32
    return %arg0, %c0_i32, %c0_i32_0 : i32, i32, i32
  }
  func.func @transform_1(%arg0: i32) -> (i32, i32, i32) {
    %c0_i32 = arith.constant 0 : i32
    %c0_i32_0 = arith.constant 0 : i32
    %c0_i32_1 = arith.constant 0 : i32
    return %arg0, %c0_i32, %c0_i32_0 : i32, i32, i32
  }
  func.func @transform_2(%arg0: i32) -> (i32, i32, i32) {
    %c0_i32 = arith.constant 0 : i32
    %c0_i32_0 = arith.constant 0 : i32
    %c0_i32_1 = arith.constant 0 : i32
    return %arg0, %c0_i32, %c0_i32_0 : i32, i32, i32
  }
  func.func @transform_3(%arg0: i32) -> (i32, i32) {
    %c0_i32 = arith.constant 0 : i32
    %c0_i32_0 = arith.constant 0 : i32
    %c0_i32_1 = arith.constant 0 : i32
    return %c0_i32, %c0_i32_0 : i32, i32
  }
  func.func @transform_4(%arg0: i32) -> (i32, i32) {
    %c0_i32 = arith.constant 0 : i32
    %c0_i32_0 = arith.constant 0 : i32
    %c0_i32_1 = arith.constant 0 : i32
    return %c0_i32, %c0_i32_0 : i32, i32
  }
  func.func @transform_5(%arg0: i32) -> (i32, i32) {
    %c0_i32 = arith.constant 0 : i32
    %c0_i32_0 = arith.constant 0 : i32
    %c0_i32_1 = arith.constant 0 : i32
    return %c0_i32, %c0_i32_0 : i32, i32
  }
  func.func @transform_6(%arg0: i32) -> (i32, i32) {
    %c0_i32 = arith.constant 0 : i32
    %c0_i32_0 = arith.constant 0 : i32
    %c0_i32_1 = arith.constant 0 : i32
    return %c0_i32, %c0_i32_0 : i32, i32
  }
  func.func @transform_7(%arg0: i32) -> (i32, i32) {
    %c0_i32 = arith.constant 0 : i32
    %c0_i32_0 = arith.constant 0 : i32
    %c0_i32_1 = arith.constant 0 : i32
    return %c0_i32, %c0_i32_0 : i32, i32
  }
  func.func @transform_8(%arg0: i32) -> (i32, i32) {
    %c0_i32 = arith.constant 0 : i32
    %c0_i32_0 = arith.constant 0 : i32
    %c0_i32_1 = arith.constant 0 : i32
    return %c0_i32, %c0_i32_0 : i32, i32
  }
  func.func @transform_9(%arg0: i32) -> (i32, i32) {
    %c0_i32 = arith.constant 0 : i32
    %c0_i32_0 = arith.constant 0 : i32
    %c0_i32_1 = arith.constant 0 : i32
    return %c0_i32, %c0_i32_0 : i32, i32
  }
  func.func @transform_10(%arg0: i32) -> (i32, i32) {
    %c0_i32 = arith.constant 0 : i32
    %c0_i32_0 = arith.constant 0 : i32
    %c0_i32_1 = arith.constant 0 : i32
    return %c0_i32, %c0_i32_0 : i32, i32
  }
  func.func @transform_11(%arg0: i32) -> (i32, i32) {
    %c0_i32 = arith.constant 0 : i32
    %c0_i32_0 = arith.constant 0 : i32
    %c0_i32_1 = arith.constant 0 : i32
    return %c0_i32, %c0_i32_0 : i32, i32
  }
  func.func @transform_12(%arg0: i32) -> (i32, i32) {
    %c0_i32 = arith.constant 0 : i32
    %c0_i32_0 = arith.constant 0 : i32
    %c0_i32_1 = arith.constant 0 : i32
    return %c0_i32, %c0_i32_0 : i32, i32
  }
  func.func @transform_13(%arg0: i32) -> (i32, i32) {
    %c0_i32 = arith.constant 0 : i32
    %c0_i32_0 = arith.constant 0 : i32
    %c0_i32_1 = arith.constant 0 : i32
    return %c0_i32, %c0_i32_0 : i32, i32
  }
  func.func @transform_14(%arg0: i32) -> (i32, i32) {
    %c0_i32 = arith.constant 0 : i32
    %c0_i32_0 = arith.constant 0 : i32
    %c0_i32_1 = arith.constant 0 : i32
    return %c0_i32, %c0_i32_0 : i32, i32
  }
  func.func @transform_15(%arg0: i32) -> (i32, i32) {
    %c0_i32 = arith.constant 0 : i32
    %c0_i32_0 = arith.constant 0 : i32
    %c0_i32_1 = arith.constant 0 : i32
    return %c0_i32, %c0_i32_0 : i32, i32
  }
}

</mosaic_0001>

<bundles_post_ra>
// kernel: tpu_custom_call.1
= control target key start
LH: loop header
LB: loop body
LE: loop exit
PB: predicated region body
PF: predicated region fallthrough
CT: control target
= control target key end

     0   :  { %s2341_s0 = inlined_call_operand.vmem [shape: f32[2,8,128], index: 0, kind: input, shape index: {}]   ;;  %s2342_s1 = inlined_call_operand.vmem [shape: f32[2,8,128], index: 1, kind: input, shape index: {}]   ;;  %s2343_s2 = inlined_call_operand.vmem [shape: f32[2,1,8], index: 2, kind: input, shape index: {}]   ;;  %s2344_s3 = inlined_call_operand.vmem [shape: f32[2,128], index: 3, kind: input, shape index: {}]   ;;  %s2345_s4 = inlined_call_operand.hbm [shape: f32[128,128], index: 4, kind: input, shape index: {}]   ;;  %s2346_s5 = inlined_call_operand.hbm [shape: f32[128,128], index: 5, kind: input, shape index: {}]   ;;  %s2347_s6 = inlined_call_operand.vmem [shape: f32[1,128], index: 6, kind: input, shape index: {}]   ;;  %s2348_s7 = inlined_call_operand.vmem [shape: f32[1,128], index: 7, kind: input, shape index: {}]   ;;  %s2349_s8 = inlined_call_operand.<no memory space> [shape: f32[1,1], index: 8, kind: input, shape index: {}]   ;;  %s2350_s9 = inlined_call_operand.hbm [shape: f32[128,128], index: 9, kind: input, shape index: {}]   ;;  %s2351_s10 = inlined_call_operand.vmem [shape: f32[1,128], index: 10, kind: input, shape index: {}]   ;;  %s2352_s11 = inlined_call_operand.vmem [shape: f32[128,256], index: 11, kind: input, shape index: {}]   ;;  %s2353_s12 = inlined_call_operand.vmem [shape: f32[1,256], index: 12, kind: input, shape index: {}]   ;;  %s2354_s13 = inlined_call_operand.vmem [shape: f32[256,1], index: 13, kind: input, shape index: {}]   ;;  %s2355_s15 = inlined_call_operand.vmem [shape: f32[2,1], index: 15, kind: output, shape index: {}]   ;;  %s2356_s14 = inlined_call_operand.<no memory space> [shape: f32[1,1], index: 14, kind: input, shape index: {}]  }
   0x1   :  { %2359 = sst [smem:[#allocation12_spill]] %s2353_s12  ;;  %v20_v0 = vstv %s2349_s8  ;;  %v22_v1 = vstv %s2356_s14 }
   0x2   :  { %2360 = sst [smem:[#allocation13_spill]] %s2355_s15  ;;  %21 = vst [vmem:[#allocation3] sm:$0x1] %v20_v0  ;;  %23 = vst [vmem:[#allocation4] sm:$0x1] %v22_v1 }
   0x3   :  { %24 = vsyncpa [#allocation6], 0 }
   0x4   :  { %25 = vsyncpa [#allocation8], 0  ;;  %s1953_s22 = smov 0  }
   0x5 LB: > { %s1959_s23 = sadd.s32 4294967295, %s1853_s22   ;;  %p1333_p0 = scmp.ge.s32.totalorder %s1853_s22, 1  ;;  %s1853_s22 = sphi %s1953_s22, %s31_s22  }
   0x6   : > { %p387_p1 = scmp.lt.s32.totalorder %s1853_s22, 3  ;;  %p2357_p2 = scmp.eq.s32.totalorder %s1959_s23, 0 }
   0x7   : > { %s1855_s14 = smov [#allocation7]   ;;  %s1856_s25 = smov [#allocation5]  }
   0x8   : > { %p1964_p3 = pnand %p1333_p0, %p387_p1  ;;  %s415_s24 = sshll.u32 %s1855_s14, 4  ;;  %s416_s24 = int_to_ptr.vmem [resolvable:$true] %s415_s24 }
   0x9   : > { %s402_s26 = sshll.u32 %s1856_s25, 4  ;;  %s1857_s28 = smov [#allocation9]   ;;  %s1976_s26 = int_to_ptr.vmem [resolvable:$true] %s402_s26 }
   0xa   : > { %s2361_s8 = scalar_select %p1964_p3, 1, 0 }
   0xb   : > { %p1708_p4 = pneg %p1964_p3  ;;  %s437_s29 = sshll.u32 %s1857_s28, 4  ;;  %s1978_s29 = int_to_ptr.vmem [resolvable:$true] %s437_s29 }
   0xc   : > { %s1755_s17 = scalar_lea.hbm %s2346_s5, 2048 }
   0xd   : > { %p1972_p5 = pnand %p2357_p2, %p1708_p4  ;;  %p1756_p6 = scmp.ne.s32.totalorder %s2346_s5, %s1755_s17 }
   0xe   : > { %p1762_p10 = scmp.lt.u32.totalorder %s1755_s17, %s2346_s5 }
   0xf   : > { %p1988_p7 = pneg %p1972_p5 }
  0x11   : > { %p1758_p8 = pnand %p1988_p7, %p1756_p6 }
  0x13   : > { %p1759_p9 = pneg %p1758_p8 }
  0x15   : > { %p1764_p11 = pnand %p1762_p10, %p1759_p9 }
  0x17   : > { %1767 = shalt.err (!%p1764_p11)
}
  0x18   : > { %s1768_s25 = scalar_lea.vmem %s416_s24, 2048  ;;  %p1776_p1 = scmp.lt.s32.totalorder %s416_s24, %s416_s24 }
  0x19   : > { %p1769_p12 = scmp.ne.s32.totalorder %s416_s24, %s1768_s25  ;;  %p1777_p4 = scmp.lt.s32.totalorder %s1768_s25, %s1768_s25 }
  0x1b   : > { %p1771_p13 = pnand %p1769_p12, %p1988_p7  ;;  %p1778_p2 = por %p1777_p4, %p1776_p1 }
  0x1d   : > { %p1772_p0 = pneg %p1771_p13 }
  0x1f   : > { %p1779_p3 = pnand %p1778_p2, %p1772_p0 }
  0x21   : > { %1782 = shalt.err (!%p1779_p3)
}
  0x22   : > { %s1858_s28 = smov 128   ;;  %s1859_s30 = smov 8  }
  0x23   : > { %1714 = dma.hbm_to_vmem [thread:$0]  (!%p1972_p5), %s2346_s5, 2048, %s416_s24, [#allocation8], %s1858_s28, %s1858_s28, %s1859_s30  }
  0x24   : > { %s1783_s21 = scalar_lea.hbm %s2345_s4, 2048 }
  0x25   : > { %p1784_p2 = scmp.ne.s32.totalorder %s2345_s4, %s1783_s21  ;;  %p1790_p8 = scmp.lt.u32.totalorder %s1783_s21, %s2345_s4 }
  0x27   : > { %p1786_p3 = pnand %p1784_p2, %p1988_p7 }
  0x29   : > { %p1787_p6 = pneg %p1786_p3 }
  0x2b   : > { %p1792_p9 = pnand %p1790_p8, %p1787_p6 }
  0x2d   : > { %1795 = shalt.err (!%p1792_p9)
}
  0x2e   : > { %s1796_s24 = scalar_lea.vmem %s1976_s26, 2048  ;;  %p1804_p13 = scmp.lt.s32.totalorder %s1976_s26, %s1976_s26 }
  0x2f   : > { %p1797_p10 = scmp.ne.s32.totalorder %s1976_s26, %s1796_s24  ;;  %p1805_p0 = scmp.lt.s32.totalorder %s1796_s24, %s1796_s24 }
  0x31   : > { %p1799_p11 = pnand %p1797_p10, %p1988_p7  ;;  %p1806_p1 = por %p1805_p0, %p1804_p13 }
  0x33   : > { %p1800_p12 = pneg %p1799_p11 }
  0x35   : > { %p1807_p4 = pnand %p1806_p1, %p1800_p12 }
  0x37   : > { %1810 = shalt.err (!%p1807_p4)
}
  0x38   : > { %1711 = dma.hbm_to_vmem [thread:$0]  (!%p1972_p5), %s2345_s4, 2048, %s1976_s26, [#allocation6], %s1858_s28, %s1858_s28, %s1859_s30  }
  0x39   : > { %s1811_s18 = scalar_lea.hbm %s2350_s9, 2048 }
  0x3a   : > { %p1812_p2 = scmp.ne.s32.totalorder %s2350_s9, %s1811_s18  ;;  %p1818_p8 = scmp.lt.u32.totalorder %s1811_s18, %s2350_s9 }
  0x3c   : > { %p1814_p3 = pnand %p1812_p2, %p1988_p7 }
  0x3e   : > { %p1815_p6 = pneg %p1814_p3 }
  0x40   : > { %p1820_p9 = pnand %p1818_p8, %p1815_p6 }
  0x42   : > { %1823 = shalt.err (!%p1820_p9)
}
  0x43   : > { %s1824_s26 = scalar_lea.vmem %s1978_s29, 2048  ;;  %p1832_p13 = scmp.lt.s32.totalorder %s1978_s29, %s1978_s29 }
  0x44   : > { %p1825_p10 = scmp.ne.s32.totalorder %s1978_s29, %s1824_s26  ;;  %p1833_p0 = scmp.lt.s32.totalorder %s1824_s26, %s1824_s26 }
  0x46   : > { %p1827_p11 = pnand %p1825_p10, %p1988_p7  ;;  %p1834_p1 = por %p1833_p0, %p1832_p13 }
  0x48   : > { %p1828_p12 = pneg %p1827_p11 }
  0x4a   : > { %p1835_p4 = pnand %p1834_p1, %p1828_p12 }
  0x4c   : > { %1838 = shalt.err (!%p1835_p4)
}
  0x4d   : > { %1717 = dma.hbm_to_vmem [thread:$0]  (!%p1972_p5), %s2350_s9, 2048, %s1978_s29, [#allocation8], %s1858_s28, %s1858_s28, %s1859_s30  }
  0x4e   : > { %p2364_p2 = scmp.ne.s32.totalorder %s2361_s8, 0 }
  0x4f   : > { %p2365_p7 = scmp.eq.s32.totalorder (!%p2364_p2), %s1959_s23, 0 }
  0x50   : > { %488 = sbr.rel (%p2364_p2) target bundleno = 1781 (0x6f5), region = 80 }
  0x57   : > { %1844 = dma.done.wait (%p2365_p7), [#allocation6], 2048   ;;  %p2366_p3 = pmov %p2365_p7 }
  0x59   : > { %1846 = vsyncadd (%p2366_p3), [#allocation6], 4294965248  ;;  %p2367_p6 = pmov %p2366_p3 }
  0x5a   : > { %p2368_p8 = pmov %p2366_p3 }
  0x5b   : > { %1848 = dma.done.wait (%p2367_p6), [#allocation8], 4096  }
  0x5c   : > { %1850 = vsyncadd (%p2368_p8), [#allocation8], 4294963200  ;;  %v1860_v2 = vmov 0.0|0.0   ;;  %vm1861_vm0 = vmmov 0   ;;  %v1862_v3 = vmov 0.0   ;;  %v574_v4 = vld [vmem:[#allocation7] sm:$0xff]  ;;  %v745_v0 = vlaneseq }
  0x5d   : > { %1560 = vmatprep.subr.bf16.mxu0 %v1860_v2  ;;  %1584 = vmatprep.subr.bf16.mxu1 %v1860_v2  ;;  %v575_v5 = vld [vmem:[#allocation7 + $0x8] sm:$0xff]  ;;  %v558_v6 = vld [vmem:[#allocation5] sm:$0xff]  ;;  %v576_v9 = vld [vmem:[#allocation7 + $0x10] sm:$0xff]  ;;  %p545_p5 = scmp.lt.s32.totalorder %s1959_s23, 1  ;;  %v1863_v55 = vmov 0   ;;  %vm821_vm1 = vcmask 57344  }
  0x5e   : > { %1477 = vmatprep.mubr.msk.f32.mxu0 %vm1861_vm0, %v1862_v3  ;;  %1512 = vmatprep.mubr.msk.f32.mxu1 %vm1861_vm0, %v1862_v3  ;;  %v1561_v7 = vpack.c.bf16 %v575_v5, %v574_v4  ;;  %v559_v8 = vld [vmem:[#allocation5 + $0x8] sm:$0xff]  ;;  %v577_v10 = vld [vmem:[#allocation7 + $0x18] sm:$0xff]  ;;  %v560_v12 = vld [vmem:[#allocation5 + $0x10] sm:$0xff]  ;;  %v2112_v1 = vshrl.u32 %v745_v0, 7  ;;  %vm833_vm2 = vcmask 64512   ;;  %s1352_s24 = scalar_lea.vmem [#allocation2], %s1853_s22 }
  0x5f   : > { %v1585_v11 = vpack.c.bf16 %v559_v8, %v558_v6  ;;  %v561_v13 = vld [vmem:[#allocation5 + $0x18] sm:$0xff]  ;;  %v1564_v14 = vpack.c.bf16 %v577_v10, %v576_v9  ;;  %v578_v16 = vld [vmem:[#allocation7 + $0x20] sm:$0xff]  ;;  %v579_v17 = vld [vmem:[#allocation7 + $0x28] sm:$0xff]  ;;  %s2087_s8 = scalar_select %p545_p5, %s1959_s23, 1  ;;  %1744 = vset.pattern.permute.xlu0 %v1863_v55 }
  0x60   : > { %1562 = vmatpush3.bf16.msra.mxu0 %v1561_v7  ;;  %v1588_v15 = vpack.c.bf16 %v561_v13, %v560_v12  ;;  %v562_v18 = vld [vmem:[#allocation5 + $0x20] sm:$0xff]  ;;  %v563_v19 = vld [vmem:[#allocation5 + $0x28] sm:$0xff]  ;;  %v1567_v20 = vpack.c.bf16 %v579_v17, %v578_v16  ;;  %v580_v22 = vld [vmem:[#allocation7 + $0x30] sm:$0xff]  ;;  %p1347_p9 = scmp.ne.s32.totalorder %s1959_s23, 1 }
  0x61   : > { %1586 = vmatpush3.bf16.msra.mxu1 %v1585_v11  ;;  %1563 = vmatprep.subr.bf16.mxu0 %v1860_v2  ;;  %v1591_v21 = vpack.c.bf16 %v563_v19, %v562_v18  ;;  %v581_v23 = vld [vmem:[#allocation7 + $0x38] sm:$0xff]  ;;  %v564_v24 = vld [vmem:[#allocation5 + $0x30] sm:$0xff]  ;;  %v582_v28 = vld [vmem:[#allocation7 + $0x40] sm:$0xff]  ;;  %s1342_s27 = sshll.u32 %s2087_s8, 3  ;;  %s555_s26 = scalar_lea.vmem %s2343_s2, %s2087_s8  ;;  %vm1865_vm3 = vmmov (!%p1347_p9), 0   ;;  %vm1249_vm4 = vcmask (!%p1347_p9), 1024  }
  0x62   : > { %1587 = vmatprep.subr.bf16.mxu1 %v1860_v2  ;;  %v565_v25 = vld [vmem:[#allocation5 + $0x38] sm:$0xff]  ;;  %v1570_v26 = vpack.c.bf16 %v581_v23, %v580_v22  ;;  %v583_v29 = vld [vmem:[#allocation7 + $0x48] sm:$0xff]  ;;  %v566_v30 = vld [vmem:[#allocation5 + $0x40] sm:$0xff]  ;;  %s552_s28 = scalar_lea.vmem %s2342_s1, %s1342_s27  ;;  %s548_s16 = scalar_lea.vmem %s2341_s0, %s1342_s27 }
  0x63   : > { %v1594_v27 = vpack.c.bf16 %v565_v25, %v564_v24  ;;  %v567_v31 = vld [vmem:[#allocation5 + $0x48] sm:$0xff]  ;;  %v1573_v32 = vpack.c.bf16 %v583_v29, %v582_v28  ;;  %v584_v34 = vld [vmem:[#allocation7 + $0x50] sm:$0xff]  ;;  %v585_v35 = vld [vmem:[#allocation7 + $0x58] sm:$0xff]  ;;  %v1864_v24 = vmov (!%p1347_p9), 0.0|0.0   ;;  %s2369_s15 = sld [smem:[#allocation12_spill]] (!%p1347_p9)  ;;  %s2370_s18 = sld [smem:[#allocation13_spill]] (!%p1347_p9) }
  0x64   : > { %1565 = vmatpush3.bf16.msra.mxu0 %v1564_v14  ;;  %v1597_v33 = vpack.c.bf16 %v567_v31, %v566_v30  ;;  %v568_v36 = vld [vmem:[#allocation5 + $0x50] sm:$0xff]  ;;  %v569_v37 = vld [vmem:[#allocation5 + $0x58] sm:$0xff]  ;;  %v1576_v38 = vpack.c.bf16 %v585_v35, %v584_v34  ;;  %v586_v40 = vld [vmem:[#allocation7 + $0x60] sm:$0xff] }
  0x65   : > { %1589 = vmatpush3.bf16.msra.mxu1 %v1588_v15  ;;  %1566 = vmatprep.subr.bf16.mxu0 %v1860_v2  ;;  %v1600_v39 = vpack.c.bf16 %v569_v37, %v568_v36  ;;  %v587_v41 = vld [vmem:[#allocation7 + $0x68] sm:$0xff]  ;;  %v570_v42 = vld [vmem:[#allocation5 + $0x60] sm:$0xff]  ;;  %v588_v46 = vld [vmem:[#allocation7 + $0x70] sm:$0xff] }
  0x66   : > { %1590 = vmatprep.subr.bf16.mxu1 %v1860_v2  ;;  %v571_v43 = vld [vmem:[#allocation5 + $0x68] sm:$0xff]  ;;  %v1579_v44 = vpack.c.bf16 %v587_v41, %v586_v40  ;;  %v589_v47 = vld [vmem:[#allocation7 + $0x78] sm:$0xff]  ;;  %v572_v48 = vld [vmem:[#allocation5 + $0x70] sm:$0xff] }
  0x67   : > { %v1603_v45 = vpack.c.bf16 %v571_v43, %v570_v42  ;;  %v573_v49 = vld [vmem:[#allocation5 + $0x78] sm:$0xff]  ;;  %v1582_v50 = vpack.c.bf16 %v589_v47, %v588_v46  ;;  %v915_v22 = vld [vmem:[#allocation9 + $0x8] sm:$0xff] (!%p1347_p9)  ;;  %v916_v23 = vld [vmem:[#allocation9 + $0x10] sm:$0xff] (!%p1347_p9) }
  0x68   : > { %1568 = vmatpush3.bf16.msra.mxu0 %v1567_v20  ;;  %v1606_v51 = vpack.c.bf16 %v573_v49, %v572_v48  ;;  %v557_v52 = vld [vmem:[%s552_s28] sm:$0xff]  ;;  %v919_v30 = vld [vmem:[#allocation9 + $0x28] sm:$0xff] (!%p1347_p9)  ;;  %v1018_v34 = vld [vmem:[%s2352_s11 + $0x18] sm:$0xff] (!%p1347_p9) }
  0x69   : > { %1592 = vmatpush3.bf16.msra.mxu1 %v1591_v21  ;;  %1569 = vmatprep.subr.bf16.mxu0 %v1860_v2  ;;  %v556_v53 = vld [vmem:[%s548_s16] sm:$0xff]  ;;  %v1016_v31 = vld [vmem:[%s2352_s11 + $0x8] sm:$0xff] (!%p1347_p9)  ;;  %v1017_v36 = vld [vmem:[%s2352_s11 + $0x10] sm:$0xff] (!%p1347_p9) }
  0x6a   : > { %1593 = vmatprep.subr.bf16.mxu1 %v1860_v2  ;;  %v739_v54 = vld [vmem:[#allocation3] sm:$0x1]  ;;  %v1344_v58 = vld [vmem:[%s2347_s6] ss:$0 sm:$0xff]  ;;  %v914_v21 = vld [vmem:[#allocation9] sm:$0xff] (!%p1347_p9) }
  0x6b   : > { %742 = vperm.xlu0 %1744, %v739_v54   ;;  %v738_v63 = vld [vmem:[%s2348_s7] sm:$0x1]  ;;  %v1609_v25 = vpack.c.bf16 (!%p1347_p9), %v915_v22, %v914_v21  ;;  %v918_v29 = vld [vmem:[#allocation9 + $0x20] sm:$0xff] (!%p1347_p9)  ;;  %v1022_v41 = vld [vmem:[%s2352_s11 + $0x38] sm:$0xff] (!%p1347_p9) }
  0x6c   : > { %1571 = vmatpush3.bf16.msra.mxu0 %v1570_v26  ;;  %v819_v6 = vld [vmem:[%s555_s26] sm:$0x1]  ;;  %v1615_v37 = vpack.c.bf16 (!%p1347_p9), %v919_v30, %v918_v29  ;;  %v1020_v40 = vld [vmem:[%s2352_s11 + $0x28] sm:$0xff] (!%p1347_p9)  ;;  %v1026_v46 = vld [vmem:[%s2352_s11 + $0x58] sm:$0xff] (!%p1347_p9) }
  0x6d   : > { %1595 = vmatpush3.bf16.msra.mxu1 %v1594_v27  ;;  %1572 = vmatprep.subr.bf16.mxu0 %v1860_v2  ;;  %v917_v26 = vld [vmem:[#allocation9 + $0x18] sm:$0xff] (!%p1347_p9)  ;;  %v1866_v27 = vmov (!%p1347_p9), 0.0   ;;  %v1636_v43 = vpack.c.bf16 (!%p1347_p9), %v1022_v41, %v1020_v40  ;;  %v1040_v21 = vld [vmem:[%s2352_s11 + $0xc8] sm:$0xff] (!%p1347_p9) }
  0x6e   : > { %1596 = vmatprep.subr.bf16.mxu1 %v1860_v2  ;;  %v1612_v28 = vpack.c.bf16 (!%p1347_p9), %v917_v26, %v916_v23  ;;  %v1015_v35 = vld [vmem:[%s2352_s11] sm:$0xff] (!%p1347_p9)  ;;  %v1042_v22 = vld [vmem:[%s2352_s11 + $0xd8] sm:$0xff] (!%p1347_p9)  ;;  %v1041_v26 = vld [vmem:[%s2352_s11 + $0xd0] sm:$0xff] (!%p1347_p9) }
  0x6f   : > { %v1019_v42 = vld [vmem:[%s2352_s11 + $0x20] sm:$0xff] (!%p1347_p9)  ;;  %v1159_v40 = vld [vmem:[%s2354_s13 + $0x98] sm:$0xff] (!%p1347_p9) }
  0x70   : > { %1574 = vmatpush3.bf16.msra.mxu0 %v1573_v32  ;;  %v920_v32 = vld [vmem:[#allocation9 + $0x30] sm:$0xff] (!%p1347_p9) }
  0x71   : > { %1598 = vmatpush3.bf16.msra.mxu1 %v1597_v33  ;;  %1575 = vmatprep.subr.bf16.mxu0 %v1860_v2  ;;  %v921_v33 = vld [vmem:[#allocation9 + $0x38] sm:$0xff] (!%p1347_p9) }
  0x72   : > { %1599 = vmatprep.subr.bf16.mxu1 %v1860_v2  ;;  %v1618_v48 = vpack.c.bf16 (!%p1347_p9), %v921_v33, %v920_v32  ;;  %v1045_v32 = vld [vmem:[%s2352_s11 + $0xf0] sm:$0xff] (!%p1347_p9) }
  0x74   : > { %1577 = vmatpush3.bf16.msra.mxu0 %v1576_v38  ;;  %v1632_v38 = vpack.c.bf16 (!%p1347_p9), %v1018_v34, %v1016_v31  ;;  %v1043_v31 = vld [vmem:[%s2352_s11 + $0xe0] sm:$0xff] (!%p1347_p9) }
  0x75   : > { %1601 = vmatpush3.bf16.msra.mxu1 %v1600_v39  ;;  %1578 = vmatprep.subr.bf16.mxu0 %v1860_v2  ;;  %v1634_v39 = vpack.c.bf16 (!%p1347_p9), %v1017_v36, %v1015_v35  ;;  %v1662_v33 = vpack.c.bf16 (!%p1347_p9), %v1045_v32, %v1043_v31  ;;  %v1156_v34 = vld [vmem:[%s2354_s13 + $0x80] sm:$0xff] (!%p1347_p9)  ;;  %v1157_v35 = vld [vmem:[%s2354_s13 + $0x88] sm:$0xff] (!%p1347_p9)  ;;  %v1055_v32 = vsub.s32 (!%p1347_p9), 1, %v2112_v1 }
  0x76   : > { %1602 = vmatprep.subr.bf16.mxu1 %v1860_v2  ;;  %v1140_v36 = vld [vmem:[%s2354_s13] sm:$0xff] (!%p1347_p9) }
  0x77   : > { %v1047_v31 = vld [vmem:[%s2369_s15] sm:$0x3] (!%p1347_p9) }
  0x78   : > { %1580 = vmatpush3.bf16.msra.mxu0 %v1579_v44  ;;  %v1021_v44 = vld [vmem:[%s2352_s11 + $0x30] sm:$0xff] (!%p1347_p9) }
  0x79   : > { %1604 = vmatpush3.bf16.msra.mxu1 %v1603_v45  ;;  %1581 = vmatprep.subr.bf16.mxu0 %v1860_v2  ;;  %v1024_v45 = vld [vmem:[%s2352_s11 + $0x48] sm:$0xff] (!%p1347_p9)  ;;  %v1638_v47 = vpack.c.bf16 (!%p1347_p9), %v1021_v44, %v1019_v42  ;;  %v1143_v44 = vld [vmem:[%s2354_s13 + $0x18] sm:$0xff] (!%p1347_p9) }
  0x7a   : > { %1605 = vmatprep.subr.bf16.mxu1 %v1860_v2  ;;  %v747_v2 = vsub.s32 0, %v2112_v1  ;;  %v1640_v49 = vpack.c.bf16 (!%p1347_p9), %v1026_v46, %v1024_v45  ;;  %v1160_v45 = vld [vmem:[%s2354_s13 + $0xa0] sm:$0xff] (!%p1347_p9)  ;;  %v1161_v46 = vld [vmem:[%s2354_s13 + $0xa8] sm:$0xff] (!%p1347_p9) }
  0x7c   : > { %1583 = vmatpush3.bf16.msra.mxu0 %v1582_v50  ;;  %v1023_v50 = vld [vmem:[%s2352_s11 + $0x40] sm:$0xff] (!%p1347_p9) }
  0x7d   : > { %1607 = vmatpush3.bf16.msra.mxu1 %v1606_v51  ;;  %1515 = vmatprep.subr.mxu0 %v1862_v3  ;;  %v1025_v51 = vld [vmem:[%s2352_s11 + $0x50] sm:$0xff] (!%p1347_p9) }
  0x7e   : > { %1520 = vmatprep.subr.mxu1 %v1862_v3  ;;  %v1642_v54 = vpack.c.bf16 (!%p1347_p9), %v1025_v51, %v1023_v50  ;;  %v1145_v50 = vld [vmem:[%s2354_s13 + $0x28] sm:$0xff] (!%p1347_p9) }
  0x7f   : > { %1478 = vmatmul.mubr.f32.vlgmr.msra.gmra.mrb[0].mxu0 %v557_v52  ;;  %v922_v52 = vld [vmem:[#allocation9 + $0x40] sm:$0xff] (!%p1347_p9) }
  0x80   : > { %1513 = vmatmul.mubr.f32.vlgmr.msra.gmra.mrb[0].mxu1 %v556_v53  ;;  %1517 = vmatprep.mubr.msk.f32.mxu0 %vm1861_vm0, %v1862_v3  ;;  %v923_v53 = vld [vmem:[#allocation9 + $0x48] sm:$0xff] (!%p1347_p9) }
  0x81   : > { %1522 = vmatprep.mubr.msk.f32.mxu1 %vm1861_vm0, %v1862_v3  ;;  %v1621_v55 = vpack.c.bf16 (!%p1347_p9), %v923_v53, %v922_v52  ;;  %v1348_v52 = vld [vmem:[%s2351_s10] ss:$0 sm:$0xff] (!%p1347_p9) }
  0xea   : > { %v743_v3 = vpop.permute.xlu0 %742 }
  0xeb   : > { %v748_v4 = vrot.slane %v743_v3, %v747_v2 }
 0x152   : > { %v656_v56 = vpop.f32.mrb[0].mxu0 }
 0x153   : > { %v726_v57 = vpop.f32.mrb[0].mxu1  ;;  %v1479_v59 = vpop.f32.mrb[1].mxu0 }
 0x154   : > { %v727_v60 = vadd.f32 %v726_v57, %v656_v56  ;;  %v1514_v61 = vpop.f32.mrb[1].mxu1  ;;  %v924_v56 = vld [vmem:[#allocation9 + $0x50] sm:$0xff] (!%p1347_p9)  ;;  %v925_v57 = vld [vmem:[#allocation9 + $0x58] sm:$0xff] (!%p1347_p9)  ;;  %v926_v59 = vld [vmem:[#allocation9 + $0x60] sm:$0xff] (!%p1347_p9) }
 0x156   : > { %v737_v62 = vadd.f32 %v1344_v58, %v727_v60  ;;  %v1624_v58 = vpack.c.bf16 (!%p1347_p9), %v925_v57, %v924_v56  ;;  %v927_v60 = vld [vmem:[#allocation9 + $0x68] sm:$0xff] (!%p1347_p9) }
 0x157   : > { %v1627_v61 = vpack.c.bf16 (!%p1347_p9), %v927_v60, %v926_v59 }
 0x158   : > { %1516 = vmatpush3.xpose.msra.mxu0 %v737_v62  ;;  %1521 = vmatpush3.msra.mxu1 %v737_v62  ;;  %v928_v62 = vld [vmem:[#allocation9 + $0x70] sm:$0xff] (!%p1347_p9) }
 0x159   : > { %1608 = vmatprep.subr.bf16.mxu0 (!%p1347_p9), %v1864_v24  ;;  %1633 = vmatprep.subr.bf16.mxu1 (!%p1347_p9), %v1632_v38  ;;  %v1141_v38 = vld [vmem:[%s2354_s13 + $0x8] sm:$0xff] (!%p1347_p9) }
 0x15a   : > { %v1666_v41 = vpack.c.bf16 (!%p1347_p9), %v1141_v38, %v1140_v36 }
 0x15b   : > { %1518 = vmatmul.mubr.f32.vlgmr.msra.gmra.mrb[2].mxu0 %v738_v63  ;;  %v929_v63 = vld [vmem:[#allocation9 + $0x78] sm:$0xff] (!%p1347_p9) }
 0x15c   : > { %1557 = vmatprep.mubr.msk.f32.mxu0 (!%p1347_p9), %vm1865_vm3, %v1866_v27  ;;  %1610 = vmatpush3.bf16.msra.mxu0 (!%p1347_p9), %v1609_v25  ;;  %v1630_v0 = vpack.c.bf16 (!%p1347_p9), %v929_v63, %v928_v62  ;;  %v1039_v25 = vld [vmem:[%s2352_s11 + $0xc0] sm:$0xff] (!%p1347_p9)  ;;  %v1162_v63 = vld [vmem:[%s2354_s13 + $0xb0] sm:$0xff] (!%p1347_p9) }
 0x15d   : > { %1611 = vmatprep.subr.bf16.mxu0 (!%p1347_p9), %v1864_v24  ;;  %v1658_v29 = vpack.c.bf16 (!%p1347_p9), %v1041_v26, %v1039_v25  ;;  %v1170_v25 = vld [vmem:[%s2354_s13 + $0xf0] sm:$0xff] (!%p1347_p9)  ;;  %v1171_v26 = vld [vmem:[%s2354_s13 + $0xf8] sm:$0xff] (!%p1347_p9) }
 0x160   : > { %1613 = vmatpush3.bf16.msra.mxu0 (!%p1347_p9), %v1612_v28  ;;  %v1046_v28 = vld [vmem:[%s2352_s11 + $0xf8] sm:$0xff] (!%p1347_p9) }
 0x161   : > { %1614 = vmatprep.subr.bf16.mxu0 (!%p1347_p9), %v1864_v24 }
 0x164   : > { %1616 = vmatpush3.bf16.msra.mxu0 (!%p1347_p9), %v1615_v37  ;;  %v1664_v37 = vpack.c.bf16 (!%p1347_p9), %v1157_v35, %v1156_v34  ;;  %v1056_v34 = vrot.slane (!%p1347_p9), %v1047_v31, %v1055_v32 }
 0x165   : > { %1617 = vmatprep.subr.bf16.mxu0 (!%p1347_p9), %v1864_v24 }
 0x168   : > { %1619 = vmatpush3.bf16.msra.mxu0 (!%p1347_p9), %v1618_v48  ;;  %v1672_v48 = vpack.c.bf16 (!%p1347_p9), %v1161_v46, %v1160_v45 }
 0x169   : > { %1620 = vmatprep.subr.bf16.mxu0 (!%p1347_p9), %v1864_v24 }
 0x16c   : > { %1622 = vmatpush3.bf16.msra.mxu0 (!%p1347_p9), %v1621_v55 }
 0x16d   : > { %1623 = vmatprep.subr.bf16.mxu0 (!%p1347_p9), %v1864_v24 }
 0x170   : > { %1625 = vmatpush3.bf16.msra.mxu0 (!%p1347_p9), %v1624_v58 }
 0x171   : > { %1626 = vmatprep.subr.bf16.mxu0 (!%p1347_p9), %v1864_v24 }
 0x174   : > { %1628 = vmatpush3.bf16.msra.mxu0 (!%p1347_p9), %v1627_v61 }
 0x175   : > { %1629 = vmatprep.subr.bf16.mxu0 (!%p1347_p9), %v1864_v24  ;;  %v1656_v24 = vpack.c.bf16 (!%p1347_p9), %v1042_v22, %v1040_v21  ;;  %v1152_v22 = vld [vmem:[%s2354_s13 + $0x60] sm:$0xff] (!%p1347_p9) }
 0x178   : > { %1631 = vmatpush3.bf16.msra.mxu0 (!%p1347_p9), %v1630_v0  ;;  %v1163_v0 = vld [vmem:[%s2354_s13 + $0xb8] sm:$0xff] (!%p1347_p9) }
 0x179   : > { %1665 = vmatprep.subr.bf16.mxu0 (!%p1347_p9), %v1664_v37 }
 0x22e   : > { %v815_v5 = vpop.f32.mrb[2].mxu0 }
 0x22f   : > { %v816_v7 = vadd.f32 %v815_v5, %v748_v4  ;;  %v1519_v8 = vpop.f32.mrb[3].mxu0  ;;  %v1028_v4 = vld [vmem:[%s2352_s11 + $0x68] sm:$0xff] (!%p1347_p9)  ;;  %v1030_v5 = vld [vmem:[%s2352_s11 + $0x78] sm:$0xff] (!%p1347_p9) }
 0x230   : > { %v1029_v8 = vld [vmem:[%s2352_s11 + $0x70] sm:$0xff] (!%p1347_p9) }
 0x231   : > { %v820_v9 = vadd.f32 %v819_v6, %v816_v7  ;;  %v1644_v6 = vpack.c.bf16 (!%p1347_p9), %v1030_v5, %v1028_v4  ;;  %v1027_v7 = vld [vmem:[%s2352_s11 + $0x60] sm:$0xff] (!%p1347_p9)  ;;  %v1146_v4 = vld [vmem:[%s2354_s13 + $0x30] sm:$0xff] (!%p1347_p9)  ;;  %v1147_v5 = vld [vmem:[%s2354_s13 + $0x38] sm:$0xff] (!%p1347_p9) }
 0x233   : > { %v822_v10 = vsel %vm821_vm1, %v820_v9, -inf }
 0x234   : > { %823 = vmax.xlane.f32.xlu0 %v822_v10  ;;  %v1032_v10 = vld [vmem:[%s2352_s11 + $0x88] sm:$0xff] (!%p1347_p9) }
 0x2c1   : > { %v824_v11 = vpop.xlane.xlu0 %823 }
 0x2c2   : > { %v825_v12 = vsub.f32 %v820_v9, %v824_v11  ;;  %v1646_v9 = vpack.c.bf16 (!%p1347_p9), %v1029_v8, %v1027_v7  ;;  %v1034_v11 = vld [vmem:[%s2352_s11 + $0x98] sm:$0xff] (!%p1347_p9)  ;;  %v1164_v7 = vld [vmem:[%s2354_s13 + $0xc0] sm:$0xff] (!%p1347_p9)  ;;  %v1165_v8 = vld [vmem:[%s2354_s13 + $0xc8] sm:$0xff] (!%p1347_p9) }
 0x2c4   : > { %v826_v13 = vmul.f32 1.442695, %v825_v12  ;;  %v1648_v12 = vpack.c.bf16 (!%p1347_p9), %v1034_v11, %v1032_v10  ;;  %v1148_v10 = vld [vmem:[%s2354_s13 + $0x40] sm:$0xff] (!%p1347_p9)  ;;  %v1149_v11 = vld [vmem:[%s2354_s13 + $0x48] sm:$0xff] (!%p1347_p9) }
 0x2c6   : > { %1745 = vpow2.f32 %v826_v13  ;;  %v1031_v13 = vld [vmem:[%s2352_s11 + $0x80] sm:$0xff] (!%p1347_p9) }
 0x2d0   : > { %v1746_v14 = vpop.eup %1745 }
 0x2d1   : > { %v828_v15 = vsel %vm821_vm1, %v1746_v14, 0.0 }
 0x2d2   : > { %829 = vadd.xlane.f32.xlu1 %v828_v15 }
 0x35f   : > { %v830_v16 = vpop.xlane.xlu1 %829 }
 0x360   : > { %1747 = vrcp.f32 %v830_v16  ;;  %v1036_v16 = vld [vmem:[%s2352_s11 + $0xa8] sm:$0xff] (!%p1347_p9) }
 0x36a   : > { %v1748_v17 = vpop.eup %1747 }
 0x36b   : > { %v832_v18 = vmul.f32 %v1748_v17, %v1746_v14  ;;  %v1033_v14 = vld [vmem:[%s2352_s11 + $0x90] sm:$0xff] (!%p1347_p9)  ;;  %v1038_v17 = vld [vmem:[%s2352_s11 + $0xb8] sm:$0xff] (!%p1347_p9) }
 0x36c   : > { %v1650_v15 = vpack.c.bf16 (!%p1347_p9), %v1033_v14, %v1031_v13  ;;  %v1166_v13 = vld [vmem:[%s2354_s13 + $0xd0] sm:$0xff] (!%p1347_p9)  ;;  %v1167_v14 = vld [vmem:[%s2354_s13 + $0xd8] sm:$0xff] (!%p1347_p9) }
 0x36d   : > { %1523 = vmatmul.mubr.msk.f32.vlgmr.msra.gmra.mrb[2].mxu1 %vm833_vm2, %v832_v18  ;;  %v1035_v18 = vld [vmem:[%s2352_s11 + $0xa0] sm:$0xff] (!%p1347_p9) }
 0x36e   : > { %1123 = vmatprep.mubr.f32.mxu1 (!%p1347_p9), %v1866_v27  ;;  %1635 = vmatpush1.bf16.msra.mxu1 (!%p1347_p9), %v1634_v39  ;;  %v1044_v27 = vld [vmem:[%s2352_s11 + $0xe8] sm:$0xff] (!%p1347_p9)  ;;  %v1158_v39 = vld [vmem:[%s2354_s13 + $0x90] sm:$0xff] (!%p1347_p9) }
 0x36f   : > { %1637 = vmatprep.subr.bf16.mxu1 (!%p1347_p9), %v1636_v43  ;;  %v1660_v30 = vpack.c.bf16 (!%p1347_p9), %v1046_v28, %v1044_v27  ;;  %v1668_v42 = vpack.c.bf16 (!%p1347_p9), %v1159_v40, %v1158_v39  ;;  %v1142_v43 = vld [vmem:[%s2354_s13 + $0x10] sm:$0xff] (!%p1347_p9)  ;;  %v1692_v27 = vpack.c.bf16 (!%p1347_p9), %v1171_v26, %v1170_v25 }
 0x370   : > { %v1154_v28 = vld [vmem:[%s2354_s13 + $0x70] sm:$0xff] (!%p1347_p9) }
 0x372   : > { %1639 = vmatpush1.bf16.msra.mxu1 (!%p1347_p9), %v1638_v47  ;;  %v1670_v47 = vpack.c.bf16 (!%p1347_p9), %v1143_v44, %v1142_v43 }
 0x373   : > { %1641 = vmatprep.subr.bf16.mxu1 (!%p1347_p9), %v1640_v49  ;;  %v1144_v49 = vld [vmem:[%s2354_s13 + $0x20] sm:$0xff] (!%p1347_p9) }
 0x374   : > { %v1674_v51 = vpack.c.bf16 (!%p1347_p9), %v1145_v50, %v1144_v49 }
 0x376   : > { %1643 = vmatpush1.bf16.msra.mxu1 (!%p1347_p9), %v1642_v54  ;;  %v1007_v54 = vld [vmem:[%s2344_s3] sm:$0x3] (!%p1347_p9) }
 0x377   : > { %1645 = vmatprep.subr.bf16.mxu1 (!%p1347_p9), %v1644_v6  ;;  %v1678_v6 = vpack.c.bf16 (!%p1347_p9), %v1147_v5, %v1146_v4 }
 0x37a   : > { %1647 = vmatpush1.bf16.msra.mxu1 (!%p1347_p9), %v1646_v9  ;;  %v1680_v9 = vpack.c.bf16 (!%p1347_p9), %v1165_v8, %v1164_v7 }
 0x37b   : > { %1649 = vmatprep.subr.bf16.mxu1 (!%p1347_p9), %v1648_v12  ;;  %v1682_v12 = vpack.c.bf16 (!%p1347_p9), %v1149_v11, %v1148_v10 }
 0x37e   : > { %1651 = vmatpush1.bf16.msra.mxu1 (!%p1347_p9), %v1650_v15  ;;  %v1684_v15 = vpack.c.bf16 (!%p1347_p9), %v1167_v14, %v1166_v13 }
 0x43b   : > { %912 = sbr.rel (%p1347_p9) target bundleno = 1781 (0x6f5), region = 96 }
 0x440   : > { %v903_v19 = vpop.f32.mrb[2].mxu1 }
 0x441   : > { %1354 = vst [vmem:[%s1352_s24 - $0x1] sm:$0x1] %v903_v19  ;;  %v1524_v20 = vpop.f32.mrb[3].mxu1  ;;  %v1652_v19 = vpack.c.bf16 (!%p1347_p9), %v1038_v17, %v1036_v16  ;;  %v1150_v16 = vld [vmem:[%s2354_s13 + $0x50] sm:$0xff] (!%p1347_p9)  ;;  %v1151_v17 = vld [vmem:[%s2354_s13 + $0x58] sm:$0xff] (!%p1347_p9) }
 0x442   : > { %v1037_v20 = vld [vmem:[%s2352_s11 + $0xb0] sm:$0xff] }
 0x443   : > { %v1654_v23 = vpack.c.bf16 %v1037_v20, %v1035_v18  ;;  %1653 = vmatprep.subr.bf16.mxu1 %v1652_v19  ;;  %v1686_v18 = vpack.c.bf16 %v1151_v17, %v1150_v16  ;;  %v1168_v19 = vld [vmem:[%s2354_s13 + $0xe0] sm:$0xff]  ;;  %v1169_v20 = vld [vmem:[%s2354_s13 + $0xe8] sm:$0xff] }
 0x444   : > { %v1688_v21 = vpack.c.bf16 %v1169_v20, %v1168_v19 }
 0x445   : > { %1655 = vmatpush1.bf16.msra.mxu1 %v1654_v23  ;;  %v1153_v23 = vld [vmem:[%s2354_s13 + $0x68] sm:$0xff] }
 0x446   : > { %1657 = vmatprep.subr.bf16.mxu1 %v1656_v24  ;;  %v1690_v24 = vpack.c.bf16 %v1153_v23, %v1152_v22 }
 0x448   : > { %v913_v3 = vld [vmem:[#allocation2] sm:$0x3] }
 0x449   : > { %1558 = vmatmul.mubr.f32.vlgmr.msra.gmra.mrb[0].mxu0 %v913_v3  ;;  %1659 = vmatpush1.bf16.msra.mxu1 %v1658_v29  ;;  %v1676_v3 = vpack.c.bf16 %v1163_v0, %v1162_v63  ;;  %v1155_v29 = vld [vmem:[%s2354_s13 + $0x78] sm:$0xff] }
 0x44a   : > { %1661 = vmatprep.subr.bf16.mxu1 %v1660_v30  ;;  %1667 = vmatpush3.bf16.msra.mxu0 %v1666_v41  ;;  %v1694_v30 = vpack.c.bf16 %v1155_v29, %v1154_v28 }
 0x44b   : > { %1669 = vmatprep.subr.bf16.mxu0 %v1668_v42 }
 0x44d   : > { %1663 = vmatpush1.bf16.msra.mxu1 %v1662_v33  ;;  %v1052_v33 = vrot.slane %v1047_v31, %v747_v2  ;;  %v1349_v2 = vld [vmem:[#allocation4] ss:$0 sm:$0xff] }
 0x44e   : > { %1671 = vmatpush3.bf16.msra.mxu0 %v1670_v47 }
 0x44f   : > { %1673 = vmatprep.subr.bf16.mxu0 %v1672_v48 }
 0x452   : > { %1675 = vmatpush3.bf16.msra.mxu0 %v1674_v51 }
 0x453   : > { %1677 = vmatprep.subr.bf16.mxu0 %v1676_v3 }
 0x456   : > { %1679 = vmatpush3.bf16.msra.mxu0 %v1678_v6 }
 0x457   : > { %1681 = vmatprep.subr.bf16.mxu0 %v1680_v9 }
 0x45a   : > { %1683 = vmatpush3.bf16.msra.mxu0 %v1682_v12 }
 0x45b   : > { %1685 = vmatprep.subr.bf16.mxu0 %v1684_v15 }
 0x45e   : > { %1687 = vmatpush3.bf16.msra.mxu0 %v1686_v18 }
 0x45f   : > { %1689 = vmatprep.subr.bf16.mxu0 %v1688_v21 }
 0x462   : > { %1691 = vmatpush3.bf16.msra.mxu0 %v1690_v24 }
 0x463   : > { %1693 = vmatprep.subr.bf16.mxu0 %v1692_v27 }
 0x466   : > { %1695 = vmatpush3.bf16.msra.mxu0 %v1694_v30 }
 0x51c   : > { %v1003_v53 = vpop.f32.mrb[0].mxu0 }
 0x51d   : > { %v1004_v55 = vadd.f32 %v1348_v52, %v1003_v53  ;;  %v1559_v56 = vpop.f32.mrb[1].mxu0 }
 0x51f   : > { %v1008_v57 = vadd.f32 %v1007_v54, %v1004_v55 }
 0x521   : > { %v1011_v58 = vmul.f32 0.70710677, %v1008_v57  ;;  %v1009_v60 = vmul.f32 0.5, %v1008_v57 }
 0x523   : > { %1749 = verf.f32 %v1011_v58 }
 0x52d   : > { %v1750_v59 = vpop.eup %1749 }
 0x52e   : > { %v1013_v61 = vadd.f32 1.0, %v1750_v59 }
 0x530   : > { %v1014_v62 = vmul.f32 %v1013_v61, %v1009_v60 }
 0x532   : > { %1124 = vmatmul.mubr.f32.vlgmr.msra.gmra.mrb[0].mxu1 %v1014_v62 }
 0x605   : > { %v1125_v35 = vpop.f32.mrb[0].mxu1 }
 0x606   : > { %v1126_v36 = vadd.f32 %v1125_v35, %v1052_v33  ;;  %v1127_v37 = vpop.f32.mrb[1].mxu1 }
 0x607   : > { %v1128_v38 = vadd.f32 %v1127_v37, %v1056_v34 }
 0x608   : > { %v1132_v39 = vmul.f32 0.70710677, %v1126_v36  ;;  %v1130_v46 = vmul.f32 0.5, %v1126_v36 }
 0x609   : > { %v1133_v40 = vmul.f32 0.70710677, %v1128_v38  ;;  %v1131_v44 = vmul.f32 0.5, %v1128_v38 }
 0x60a   : > { %1751 = verf.f32 %v1132_v39 }
 0x60b   : > { %1753 = verf.f32 %v1133_v40 }
 0x614   : > { %v1752_v41 = vpop.eup %1751 }
 0x615   : > { %v1754_v42 = vpop.eup %1753  ;;  %v1136_v43 = vadd.f32 1.0, %v1752_v41 }
 0x616   : > { %v1137_v45 = vadd.f32 1.0, %v1754_v42 }
 0x617   : > { %v1138_v48 = vmul.f32 %v1136_v43, %v1130_v46 }
 0x618   : > { %v1139_v47 = vmul.f32 %v1137_v45, %v1131_v44 }
 0x61a   : > { %1243 = vmatprep.mubr.f32.mxu0 %v1139_v47 }
 0x61b   : > { %1244 = vmatmul.mubr.f32.vlgmr.msra.gmra.mrb[2].mxu0 %v1138_v48 }
 0x6ee   : > { %v1442_v1 = vpop.f32.mrb[2].mxu0 }
 0x6ef   : > { %v1443_v49 = vpop.f32.mrb[3].mxu0 }
 0x6f0   : > { %v1444_v50 = vadd.f32 %v1443_v49, %v1442_v1 }
 0x6f2   : > { %v1246_v51 = vadd.f32 %v1444_v50, %v1349_v2 }
 0x6f4   : > { %1250 = vst.msk [vmem:[%s2370_s18] sm:$0x3] %vm1249_vm4, %v1246_v51 }
 0x6f5 PF: > { %s31_s22 = sadd.s32 1, %s1853_s22  }
 0x6f6   : > { %p28_p10 = scmp.ge.s32.totalorder %s31_s22, 4  }
 0x6f8   :  { %30 = sbr.rel (!%p28_p10) target bundleno = 5 (0x5), region = 130 }
 0x6ff   :  { %1262 = vsyncpa [#allocation6], 1 }
 0x700   :  { %1264 = vsyncpa [#allocation6 + $0x1], 1 }
 0x701   :  { %1265 = vsyncpa [#allocation8], 1 }

</bundles_post_ra>
